<compile_context>
chip_gen: v7x
topology: tpu7x:2x2x1
jax: 0.10.0
libtpu: 0.0.40
codegen_flags: <defaults>
</compile_context>

<pallas_src>
import jax
import jax.numpy as jnp
from jax.experimental import pallas as pl
from jax.experimental.pallas import tpu as pltpu

LAYER_DIMS = [100, 100, 64, 64, 64, 32, 16, 1]   # true output dims of the 8 Linear layers
N_LAYERS = len(LAYER_DIMS)
PAD = 128                                        # lane-friendly padded width for every layer


def _round_up(n, m):
    return ((n + m - 1) // m) * m


def mlp_kernel(x_ref, *refs):
    """Fused 8x(Linear -> ReLU) on one batch tile.

    Weights are bf16 (MXU-native); accumulation, bias-add and ReLU are f32.
    """
    w_refs = refs[:N_LAYERS]
    b_refs = refs[N_LAYERS:2 * N_LAYERS]
    o_ref = refs[2 * N_LAYERS]

    h = x_ref[...].astype(jnp.float32)
    for w_ref, b_ref in zip(w_refs, b_refs):
        acc = jnp.dot(h.astype(jnp.bfloat16), w_ref[...],
                      preferred_element_type=jnp.float32)       # MXU, f32 accum
        h = jnp.maximum(acc + b_ref[...], 0.0)                  # VPU, f32
    o_ref[...] = h.astype(o_ref.dtype)


def mlp_forward(x, weights_p, biases_p, *, tile_b=512):
    """x: (batch, input_dim) f32 -> (batch, 1) f32.

    weights_p / biases_p are the padded (128-wide) bf16 / f32 parameters from
    `pad_and_cast_params`.
    """
    batch, in_dim = x.shape

    # Tile the batch; pad it so the grid divides evenly (padded rows are junk
    # and sliced off below — every block stays full & unmasked).
    tile_b = min(tile_b, _round_up(batch, 8))
    batch_p = _round_up(batch, tile_b)
    if batch_p != batch:
        x = jnp.pad(x, ((0, batch_p - batch), (0, 0)))
    grid = (batch_p // tile_b,)

    x_spec = pl.BlockSpec((tile_b, in_dim), lambda i: (i, 0))
    # Constant index_map -> weights/biases stay resident in VMEM across grid steps.
    w_specs = [pl.BlockSpec(w.shape, lambda i: (0, 0)) for w in weights_p]
    b_specs = [pl.BlockSpec(b.shape, lambda i: (0, 0)) for b in biases_p]
    out_spec = pl.BlockSpec((tile_b, PAD), lambda i: (i, 0))

    out = pl.pallas_call(
        mlp_kernel,
        out_shape=jax.ShapeDtypeStruct((batch_p, PAD), x.dtype),
        grid=grid,
        in_specs=[x_spec] + w_specs + b_specs,
        out_specs=out_spec,
        compiler_params=pltpu.CompilerParams(
            dimension_semantics=("parallel",),   # megacore sharding on v7x
        ),
    )(x, *weights_p, *biases_p)

    # Real result is column 0 of the lane-dense slab; drop padded rows/cols.
    return out[:batch, :1]


def init_params(input_dim, key):
    """PyTorch-style nn.Linear init at the module's true shapes (f32)."""
    weights, biases = [], []
    in_dim = input_dim
    for out_dim in LAYER_DIMS:
        key, kw, kb = jax.random.split(key, 3)
        bound = 1.0 / (in_dim ** 0.5)
        # PyTorch Linear weight is (out, in); we store its transpose (in, out).
        w = jax.random.uniform(kw, (in_dim, out_dim), jnp.float32, -bound, bound)
        b = jax.random.uniform(kb, (1, out_dim), jnp.float32, -bound, bound)
        weights.append(w)
        biases.append(b)
        in_dim = out_dim
    return weights, biases


def pad_and_cast_params(weights, biases, input_dim):
    """Zero-pad every layer to 128-wide outputs and cast weights to bf16 (once)."""
    pw, pb = [], []
    in_p = input_dim                       # first layer keeps the true input width
    for w, b in zip(weights, biases):
        d_in, d_out = w.shape
        w_p = jnp.zeros((in_p, PAD), jnp.float32).at[:d_in, :d_out].set(w)
        b_p = jnp.zeros((1, PAD), jnp.float32).at[:, :d_out].set(b)
        pw.append(w_p.astype(jnp.bfloat16))    # bf16 for the MXU
        pb.append(b_p)                         # bias stays f32 (VPU)
        in_p = PAD
    return pw, pb


def reference_forward(x, weights, biases):
    """Pure-JAX reference with the same bf16-matmul / f32-accumulate recipe,
    using the original (unpadded) parameters."""
    h = x.astype(jnp.float32)
    for w, b in zip(weights, biases):
        acc = jnp.dot(h.astype(jnp.bfloat16), w.astype(jnp.bfloat16),
                      preferred_element_type=jnp.float32)
        h = jnp.maximum(acc + b, 0.0)
    return h


if __name__ == "__main__":
    key = jax.random.PRNGKey(0)
    batch, input_dim = 8, 32

    key, kx = jax.random.split(key)
    x = jax.random.normal(kx, (batch, input_dim), jnp.float32)
    weights, biases = init_params(input_dim, key)
    weights_p, biases_p = pad_and_cast_params(weights, biases, input_dim)

    # Small-shape run (grid of 1 tile).
    out = mlp_forward(x, weights_p, biases_p)
    out = jax.block_until_ready(out)
    ref = reference_forward(x, weights, biases)
    assert out.shape == (batch, 1), out.shape
    assert jnp.allclose(out, ref, atol=1e-4, rtol=1e-4), "mismatch vs JAX reference (small)"

    # Exercise the tiled/pipelined path: batch not a multiple of the tile.
    key, kx2 = jax.random.split(key)
    x_big = jax.random.normal(kx2, (520, input_dim), jnp.float32)
    out_big = jax.block_until_ready(mlp_forward(x_big, weights_p, biases_p, tile_b=256))
    ref_big = reference_forward(x_big, weights, biases)
    assert out_big.shape == (520, 1), out_big.shape
    assert jnp.allclose(out_big, ref_big, atol=1e-4, rtol=1e-4), "mismatch vs JAX reference (tiled)"

    print("KERNEL_OK")
</pallas_src>

<mosaic_0001>
module attributes {stable_mosaic.version = 11 : i64} {
  func.func @mlp_kernel(%arg0: i32, %arg1: memref<8x32xf32, #tpu.memory_space<vmem>>, %arg2: memref<32x128xbf16, #tpu.memory_space<vmem>>, %arg3: memref<128x128xbf16, #tpu.memory_space<vmem>>, %arg4: memref<128x128xbf16, #tpu.memory_space<vmem>>, %arg5: memref<128x128xbf16, #tpu.memory_space<vmem>>, %arg6: memref<128x128xbf16, #tpu.memory_space<vmem>>, %arg7: memref<128x128xbf16, #tpu.memory_space<vmem>>, %arg8: memref<128x128xbf16, #tpu.memory_space<vmem>>, %arg9: memref<128x128xbf16, #tpu.memory_space<vmem>>, %arg10: memref<1x128xf32, #tpu.memory_space<vmem>>, %arg11: memref<1x128xf32, #tpu.memory_space<vmem>>, %arg12: memref<1x128xf32, #tpu.memory_space<vmem>>, %arg13: memref<1x128xf32, #tpu.memory_space<vmem>>, %arg14: memref<1x128xf32, #tpu.memory_space<vmem>>, %arg15: memref<1x128xf32, #tpu.memory_space<vmem>>, %arg16: memref<1x128xf32, #tpu.memory_space<vmem>>, %arg17: memref<1x128xf32, #tpu.memory_space<vmem>>, %arg18: memref<8x128xf32, #tpu.memory_space<vmem>>) attributes {dimension_semantics = [#tpu.dimension_semantics<parallel>], iteration_bounds = array<i64: 1>, scalar_prefetch = 0 : i64, scratch_operands = 0 : i64, tpu.core_type = #tpu.core_type<tc>, window_params = [{transform_indices = @transform_0, window_bounds = array<i64: 8, 32>}, {pipeline_mode = #tpu.pipeline_mode<synchronous>, transform_indices = @transform_1, window_bounds = array<i64: 32, 128>}, {pipeline_mode = #tpu.pipeline_mode<synchronous>, transform_indices = @transform_2, window_bounds = array<i64: 128, 128>}, {pipeline_mode = #tpu.pipeline_mode<synchronous>, transform_indices = @transform_3, window_bounds = array<i64: 128, 128>}, {pipeline_mode = #tpu.pipeline_mode<synchronous>, transform_indices = @transform_4, window_bounds = array<i64: 128, 128>}, {pipeline_mode = #tpu.pipeline_mode<synchronous>, transform_indices = @transform_5, window_bounds = array<i64: 128, 128>}, {pipeline_mode = #tpu.pipeline_mode<synchronous>, transform_indices = @transform_6, window_bounds = array<i64: 128, 128>}, {pipeline_mode = #tpu.pipeline_mode<synchronous>, transform_indices = @transform_7, window_bounds = array<i64: 128, 128>}, {pipeline_mode = #tpu.pipeline_mode<synchronous>, transform_indices = @transform_8, window_bounds = array<i64: 128, 128>}, {pipeline_mode = #tpu.pipeline_mode<synchronous>, transform_indices = @transform_9, window_bounds = array<i64: 1, 128>}, {pipeline_mode = #tpu.pipeline_mode<synchronous>, transform_indices = @transform_10, window_bounds = array<i64: 1, 128>}, {pipeline_mode = #tpu.pipeline_mode<synchronous>, transform_indices = @transform_11, window_bounds = array<i64: 1, 128>}, {pipeline_mode = #tpu.pipeline_mode<synchronous>, transform_indices = @transform_12, window_bounds = array<i64: 1, 128>}, {pipeline_mode = #tpu.pipeline_mode<synchronous>, transform_indices = @transform_13, window_bounds = array<i64: 1, 128>}, {pipeline_mode = #tpu.pipeline_mode<synchronous>, transform_indices = @transform_14, window_bounds = array<i64: 1, 128>}, {pipeline_mode = #tpu.pipeline_mode<synchronous>, transform_indices = @transform_15, window_bounds = array<i64: 1, 128>}, {pipeline_mode = #tpu.pipeline_mode<synchronous>, transform_indices = @transform_16, window_bounds = array<i64: 1, 128>}, {transform_indices = @transform_17, window_bounds = array<i64: 8, 128>}]} {
    %c0 = arith.constant 0 : index
    %c0_0 = arith.constant 0 : index
    %0 = vector.load %arg1[%c0, %c0_0] : memref<8x32xf32, #tpu.memory_space<vmem>>, vector<8x32xf32>
    %1 = arith.truncf %0 : vector<8x32xf32> to vector<8x32xbf16>
    %c0_1 = arith.constant 0 : index
    %c0_2 = arith.constant 0 : index
    %2 = vector.load %arg2[%c0_1, %c0_2] : memref<32x128xbf16, #tpu.memory_space<vmem>>, vector<32x128xbf16>
    %cst = arith.constant dense<0.000000e+00> : vector<8x128xf32>
    %3 = tpu.matmul %1, %2, %cst {dimension_numbers = #tpu.dot_dimension_numbers<[1], [0], [0], [1], [0, 0, 1, 1], [], []>} : vector<8x32xbf16>, vector<32x128xbf16>, vector<8x128xf32> -> vector<8x128xf32>
    %c0_3 = arith.constant 0 : index
    %c0_4 = arith.constant 0 : index
    %4 = vector.load %arg10[%c0_3, %c0_4] : memref<1x128xf32, #tpu.memory_space<vmem>>, vector<1x128xf32>
    %5 = vector.broadcast %4 : vector<1x128xf32> to vector<8x128xf32>
    %6 = arith.addf %3, %5 : vector<8x128xf32>
    %cst_5 = arith.constant 0.000000e+00 : f32
    %7 = vector.broadcast %cst_5 : f32 to vector<8x128xf32>
    %8 = arith.maximumf %6, %7 : vector<8x128xf32>
    %9 = arith.truncf %8 : vector<8x128xf32> to vector<8x128xbf16>
    %c0_6 = arith.constant 0 : index
    %c0_7 = arith.constant 0 : index
    %10 = vector.load %arg3[%c0_6, %c0_7] : memref<128x128xbf16, #tpu.memory_space<vmem>>, vector<128x128xbf16>
    %cst_8 = arith.constant dense<0.000000e+00> : vector<8x128xf32>
    %11 = tpu.matmul %9, %10, %cst_8 {dimension_numbers = #tpu.dot_dimension_numbers<[1], [0], [0], [1], [0, 0, 1, 1], [], []>} : vector<8x128xbf16>, vector<128x128xbf16>, vector<8x128xf32> -> vector<8x128xf32>
    %c0_9 = arith.constant 0 : index
    %c0_10 = arith.constant 0 : index
    %12 = vector.load %arg11[%c0_9, %c0_10] : memref<1x128xf32, #tpu.memory_space<vmem>>, vector<1x128xf32>
    %13 = vector.broadcast %12 : vector<1x128xf32> to vector<8x128xf32>
    %14 = arith.addf %11, %13 : vector<8x128xf32>
    %cst_11 = arith.constant 0.000000e+00 : f32
    %15 = vector.broadcast %cst_11 : f32 to vector<8x128xf32>
    %16 = arith.maximumf %14, %15 : vector<8x128xf32>
    %17 = arith.truncf %16 : vector<8x128xf32> to vector<8x128xbf16>
    %c0_12 = arith.constant 0 : index
    %c0_13 = arith.constant 0 : index
    %18 = vector.load %arg4[%c0_12, %c0_13] : memref<128x128xbf16, #tpu.memory_space<vmem>>, vector<128x128xbf16>
    %cst_14 = arith.constant dense<0.000000e+00> : vector<8x128xf32>
    %19 = tpu.matmul %17, %18, %cst_14 {dimension_numbers = #tpu.dot_dimension_numbers<[1], [0], [0], [1], [0, 0, 1, 1], [], []>} : vector<8x128xbf16>, vector<128x128xbf16>, vector<8x128xf32> -> vector<8x128xf32>
    %c0_15 = arith.constant 0 : index
    %c0_16 = arith.constant 0 : index
    %20 = vector.load %arg12[%c0_15, %c0_16] : memref<1x128xf32, #tpu.memory_space<vmem>>, vector<1x128xf32>
    %21 = vector.broadcast %20 : vector<1x128xf32> to vector<8x128xf32>
    %22 = arith.addf %19, %21 : vector<8x128xf32>
    %cst_17 = arith.constant 0.000000e+00 : f32
    %23 = vector.broadcast %cst_17 : f32 to vector<8x128xf32>
    %24 = arith.maximumf %22, %23 : vector<8x128xf32>
    %25 = arith.truncf %24 : vector<8x128xf32> to vector<8x128xbf16>
    %c0_18 = arith.constant 0 : index
    %c0_19 = arith.constant 0 : index
    %26 = vector.load %arg5[%c0_18, %c0_19] : memref<128x128xbf16, #tpu.memory_space<vmem>>, vector<128x128xbf16>
    %cst_20 = arith.constant dense<0.000000e+00> : vector<8x128xf32>
    %27 = tpu.matmul %25, %26, %cst_20 {dimension_numbers = #tpu.dot_dimension_numbers<[1], [0], [0], [1], [0, 0, 1, 1], [], []>} : vector<8x128xbf16>, vector<128x128xbf16>, vector<8x128xf32> -> vector<8x128xf32>
    %c0_21 = arith.constant 0 : index
    %c0_22 = arith.constant 0 : index
    %28 = vector.load %arg13[%c0_21, %c0_22] : memref<1x128xf32, #tpu.memory_space<vmem>>, vector<1x128xf32>
    %29 = vector.broadcast %28 : vector<1x128xf32> to vector<8x128xf32>
    %30 = arith.addf %27, %29 : vector<8x128xf32>
    %cst_23 = arith.constant 0.000000e+00 : f32
    %31 = vector.broadcast %cst_23 : f32 to vector<8x128xf32>
    %32 = arith.maximumf %30, %31 : vector<8x128xf32>
    %33 = arith.truncf %32 : vector<8x128xf32> to vector<8x128xbf16>
    %c0_24 = arith.constant 0 : index
    %c0_25 = arith.constant 0 : index
    %34 = vector.load %arg6[%c0_24, %c0_25] : memref<128x128xbf16, #tpu.memory_space<vmem>>, vector<128x128xbf16>
    %cst_26 = arith.constant dense<0.000000e+00> : vector<8x128xf32>
    %35 = tpu.matmul %33, %34, %cst_26 {dimension_numbers = #tpu.dot_dimension_numbers<[1], [0], [0], [1], [0, 0, 1, 1], [], []>} : vector<8x128xbf16>, vector<128x128xbf16>, vector<8x128xf32> -> vector<8x128xf32>
    %c0_27 = arith.constant 0 : index
    %c0_28 = arith.constant 0 : index
    %36 = vector.load %arg14[%c0_27, %c0_28] : memref<1x128xf32, #tpu.memory_space<vmem>>, vector<1x128xf32>
    %37 = vector.broadcast %36 : vector<1x128xf32> to vector<8x128xf32>
    %38 = arith.addf %35, %37 : vector<8x128xf32>
    %cst_29 = arith.constant 0.000000e+00 : f32
    %39 = vector.broadcast %cst_29 : f32 to vector<8x128xf32>
    %40 = arith.maximumf %38, %39 : vector<8x128xf32>
    %41 = arith.truncf %40 : vector<8x128xf32> to vector<8x128xbf16>
    %c0_30 = arith.constant 0 : index
    %c0_31 = arith.constant 0 : index
    %42 = vector.load %arg7[%c0_30, %c0_31] : memref<128x128xbf16, #tpu.memory_space<vmem>>, vector<128x128xbf16>
    %cst_32 = arith.constant dense<0.000000e+00> : vector<8x128xf32>
    %43 = tpu.matmul %41, %42, %cst_32 {dimension_numbers = #tpu.dot_dimension_numbers<[1], [0], [0], [1], [0, 0, 1, 1], [], []>} : vector<8x128xbf16>, vector<128x128xbf16>, vector<8x128xf32> -> vector<8x128xf32>
    %c0_33 = arith.constant 0 : index
    %c0_34 = arith.constant 0 : index
    %44 = vector.load %arg15[%c0_33, %c0_34] : memref<1x128xf32, #tpu.memory_space<vmem>>, vector<1x128xf32>
    %45 = vector.broadcast %44 : vector<1x128xf32> to vector<8x128xf32>
    %46 = arith.addf %43, %45 : vector<8x128xf32>
    %cst_35 = arith.constant 0.000000e+00 : f32
    %47 = vector.broadcast %cst_35 : f32 to vector<8x128xf32>
    %48 = arith.maximumf %46, %47 : vector<8x128xf32>
    %49 = arith.truncf %48 : vector<8x128xf32> to vector<8x128xbf16>
    %c0_36 = arith.constant 0 : index
    %c0_37 = arith.constant 0 : index
    %50 = vector.load %arg8[%c0_36, %c0_37] : memref<128x128xbf16, #tpu.memory_space<vmem>>, vector<128x128xbf16>
    %cst_38 = arith.constant dense<0.000000e+00> : vector<8x128xf32>
    %51 = tpu.matmul %49, %50, %cst_38 {dimension_numbers = #tpu.dot_dimension_numbers<[1], [0], [0], [1], [0, 0, 1, 1], [], []>} : vector<8x128xbf16>, vector<128x128xbf16>, vector<8x128xf32> -> vector<8x128xf32>
    %c0_39 = arith.constant 0 : index
    %c0_40 = arith.constant 0 : index
    %52 = vector.load %arg16[%c0_39, %c0_40] : memref<1x128xf32, #tpu.memory_space<vmem>>, vector<1x128xf32>
    %53 = vector.broadcast %52 : vector<1x128xf32> to vector<8x128xf32>
    %54 = arith.addf %51, %53 : vector<8x128xf32>
    %cst_41 = arith.constant 0.000000e+00 : f32
    %55 = vector.broadcast %cst_41 : f32 to vector<8x128xf32>
    %56 = arith.maximumf %54, %55 : vector<8x128xf32>
    %57 = arith.truncf %56 : vector<8x128xf32> to vector<8x128xbf16>
    %c0_42 = arith.constant 0 : index
    %c0_43 = arith.constant 0 : index
    %58 = vector.load %arg9[%c0_42, %c0_43] : memref<128x128xbf16, #tpu.memory_space<vmem>>, vector<128x128xbf16>
    %cst_44 = arith.constant dense<0.000000e+00> : vector<8x128xf32>
    %59 = tpu.matmul %57, %58, %cst_44 {dimension_numbers = #tpu.dot_dimension_numbers<[1], [0], [0], [1], [0, 0, 1, 1], [], []>} : vector<8x128xbf16>, vector<128x128xbf16>, vector<8x128xf32> -> vector<8x128xf32>
    %c0_45 = arith.constant 0 : index
    %c0_46 = arith.constant 0 : index
    %60 = vector.load %arg17[%c0_45, %c0_46] : memref<1x128xf32, #tpu.memory_space<vmem>>, vector<1x128xf32>
    %61 = vector.broadcast %60 : vector<1x128xf32> to vector<8x128xf32>
    %62 = arith.addf %59, %61 : vector<8x128xf32>
    %cst_47 = arith.constant 0.000000e+00 : f32
    %63 = vector.broadcast %cst_47 : f32 to vector<8x128xf32>
    %64 = arith.maximumf %62, %63 : vector<8x128xf32>
    %c0_48 = arith.constant 0 : index
    %c0_49 = arith.constant 0 : index
    %65 = vector.load %arg18[%c0_48, %c0_49] : memref<8x128xf32, #tpu.memory_space<vmem>>, vector<8x128xf32>
    tpu.vector_store %arg18[%c0_48, %c0_49], %64 {strides = array<i32>} : memref<8x128xf32, #tpu.memory_space<vmem>>, vector<8x128xf32>,
    return
  }
  func.func @transform_0(%arg0: i32) -> (i32, i32) {
    %c0_i32 = arith.constant 0 : i32
    %c0_i32_0 = arith.constant 0 : i32
    return %arg0, %c0_i32 : i32, i32
  }
  func.func @transform_1(%arg0: i32) -> (i32, i32) {
    %c0_i32 = arith.constant 0 : i32
    %c0_i32_0 = arith.constant 0 : i32
    %c0_i32_1 = arith.constant 0 : i32
    return %c0_i32, %c0_i32_0 : i32, i32
  }
  func.func @transform_2(%arg0: i32) -> (i32, i32) {
    %c0_i32 = arith.constant 0 : i32
    %c0_i32_0 = arith.constant 0 : i32
    %c0_i32_1 = arith.constant 0 : i32
    return %c0_i32, %c0_i32_0 : i32, i32
  }
  func.func @transform_3(%arg0: i32) -> (i32, i32) {
    %c0_i32 = arith.constant 0 : i32
    %c0_i32_0 = arith.constant 0 : i32
    %c0_i32_1 = arith.constant 0 : i32
    return %c0_i32, %c0_i32_0 : i32, i32
  }
  func.func @transform_4(%arg0: i32) -> (i32, i32) {
    %c0_i32 = arith.constant 0 : i32
    %c0_i32_0 = arith.constant 0 : i32
    %c0_i32_1 = arith.constant 0 : i32
    return %c0_i32, %c0_i32_0 : i32, i32
  }
  func.func @transform_5(%arg0: i32) -> (i32, i32) {
    %c0_i32 = arith.constant 0 : i32
    %c0_i32_0 = arith.constant 0 : i32
    %c0_i32_1 = arith.constant 0 : i32
    return %c0_i32, %c0_i32_0 : i32, i32
  }
  func.func @transform_6(%arg0: i32) -> (i32, i32) {
    %c0_i32 = arith.constant 0 : i32
    %c0_i32_0 = arith.constant 0 : i32
    %c0_i32_1 = arith.constant 0 : i32
    return %c0_i32, %c0_i32_0 : i32, i32
  }
  func.func @transform_7(%arg0: i32) -> (i32, i32) {
    %c0_i32 = arith.constant 0 : i32
    %c0_i32_0 = arith.constant 0 : i32
    %c0_i32_1 = arith.constant 0 : i32
    return %c0_i32, %c0_i32_0 : i32, i32
  }
  func.func @transform_8(%arg0: i32) -> (i32, i32) {
    %c0_i32 = arith.constant 0 : i32
    %c0_i32_0 = arith.constant 0 : i32
    %c0_i32_1 = arith.constant 0 : i32
    return %c0_i32, %c0_i32_0 : i32, i32
  }
  func.func @transform_9(%arg0: i32) -> (i32, i32) {
    %c0_i32 = arith.constant 0 : i32
    %c0_i32_0 = arith.constant 0 : i32
    %c0_i32_1 = arith.constant 0 : i32
    return %c0_i32, %c0_i32_0 : i32, i32
  }
  func.func @transform_10(%arg0: i32) -> (i32, i32) {
    %c0_i32 = arith.constant 0 : i32
    %c0_i32_0 = arith.constant 0 : i32
    %c0_i32_1 = arith.constant 0 : i32
    return %c0_i32, %c0_i32_0 : i32, i32
  }
  func.func @transform_11(%arg0: i32) -> (i32, i32) {
    %c0_i32 = arith.constant 0 : i32
    %c0_i32_0 = arith.constant 0 : i32
    %c0_i32_1 = arith.constant 0 : i32
    return %c0_i32, %c0_i32_0 : i32, i32
  }
  func.func @transform_12(%arg0: i32) -> (i32, i32) {
    %c0_i32 = arith.constant 0 : i32
    %c0_i32_0 = arith.constant 0 : i32
    %c0_i32_1 = arith.constant 0 : i32
    return %c0_i32, %c0_i32_0 : i32, i32
  }
  func.func @transform_13(%arg0: i32) -> (i32, i32) {
    %c0_i32 = arith.constant 0 : i32
    %c0_i32_0 = arith.constant 0 : i32
    %c0_i32_1 = arith.constant 0 : i32
    return %c0_i32, %c0_i32_0 : i32, i32
  }
  func.func @transform_14(%arg0: i32) -> (i32, i32) {
    %c0_i32 = arith.constant 0 : i32
    %c0_i32_0 = arith.constant 0 : i32
    %c0_i32_1 = arith.constant 0 : i32
    return %c0_i32, %c0_i32_0 : i32, i32
  }
  func.func @transform_15(%arg0: i32) -> (i32, i32) {
    %c0_i32 = arith.constant 0 : i32
    %c0_i32_0 = arith.constant 0 : i32
    %c0_i32_1 = arith.constant 0 : i32
    return %c0_i32, %c0_i32_0 : i32, i32
  }
  func.func @transform_16(%arg0: i32) -> (i32, i32) {
    %c0_i32 = arith.constant 0 : i32
    %c0_i32_0 = arith.constant 0 : i32
    %c0_i32_1 = arith.constant 0 : i32
    return %c0_i32, %c0_i32_0 : i32, i32
  }
  func.func @transform_17(%arg0: i32) -> (i32, i32) {
    %c0_i32 = arith.constant 0 : i32
    %c0_i32_0 = arith.constant 0 : i32
    return %arg0, %c0_i32 : i32, i32
  }
}

</mosaic_0001>

<bundles_post_ra>
// kernel: tpu_custom_call.1
= control target key start
LH: loop header
LB: loop body
LE: loop exit
PB: predicated region body
PF: predicated region fallthrough
CT: control target
= control target key end

     0   :  { %s1990_s0 = inlined_call_operand.hbm [shape: f32[8,32], index: 0, kind: input, shape index: {}]   ;;  %s1991_s1 = inlined_call_operand.hbm [shape: bf16[32,128], index: 1, kind: input, shape index: {}]   ;;  %s1992_s2 = inlined_call_operand.hbm [shape: bf16[128,128], index: 2, kind: input, shape index: {}]   ;;  %s1993_s3 = inlined_call_operand.hbm [shape: bf16[128,128], index: 3, kind: input, shape index: {}]   ;;  %s1994_s4 = inlined_call_operand.hbm [shape: bf16[128,128], index: 4, kind: input, shape index: {}]   ;;  %s1995_s5 = inlined_call_operand.hbm [shape: bf16[128,128], index: 5, kind: input, shape index: {}]   ;;  %s1996_s6 = inlined_call_operand.hbm [shape: bf16[128,128], index: 6, kind: input, shape index: {}]   ;;  %s1997_s7 = inlined_call_operand.hbm [shape: bf16[128,128], index: 7, kind: input, shape index: {}]   ;;  %s1998_s8 = inlined_call_operand.hbm [shape: bf16[128,128], index: 8, kind: input, shape index: {}]   ;;  %s1999_s9 = inlined_call_operand.vmem [shape: f32[1,128], index: 9, kind: input, shape index: {}]   ;;  %s2000_s10 = inlined_call_operand.vmem [shape: f32[1,128], index: 10, kind: input, shape index: {}]   ;;  %s2001_s11 = inlined_call_operand.vmem [shape: f32[1,128], index: 11, kind: input, shape index: {}]   ;;  %s2002_s12 = inlined_call_operand.vmem [shape: f32[1,128], index: 12, kind: input, shape index: {}]   ;;  %s2003_s13 = inlined_call_operand.vmem [shape: f32[1,128], index: 13, kind: input, shape index: {}]   ;;  %s2004_s14 = inlined_call_operand.vmem [shape: f32[1,128], index: 14, kind: input, shape index: {}]   ;;  %s2005_s15 = inlined_call_operand.vmem [shape: f32[1,128], index: 15, kind: input, shape index: {}]   ;;  %s2006_s16 = inlined_call_operand.vmem [shape: f32[1,128], index: 16, kind: input, shape index: {}]   ;;  %s2007_s17 = inlined_call_operand.hbm [shape: f32[8,128], index: 17, kind: output, shape index: {}]  }
   0x1   :  { %2011 = sst [smem:[#allocation24_spill]] %s1990_s0 }
   0x2   :  { %2012 = sst [smem:[#allocation25_spill]] %s1991_s1 }
   0x3   :  { %2013 = sst [smem:[#allocation26_spill]] %s2006_s16 }
   0x4   :  { %2014 = sst [smem:[#allocation27_spill]] %s2007_s17 }
   0x5   :  { %22 = vsyncpa [#allocation3], 0 }
   0x6   :  { %23 = vsyncpa [#allocation6], 0 }
   0x7   :  { %24 = vsyncpa [#allocation9], 0 }
   0x8   :  { %25 = vsyncpa [#allocation12], 0 }
   0x9   :  { %26 = vsyncpa [#allocation15], 0 }
   0xa   :  { %27 = vsyncpa [#allocation4], 0  ;;  %s1644_s24 = smov [#allocation5]   ;;  %s2015_s28 = sld [smem:[#allocation25_spill]] }
   0xb   :  { %s43_s25 = sshll.u32 %s1644_s24, 4  ;;  %s44_s25 = int_to_ptr.vmem [resolvable:$true] %s43_s25 }
  0x10   :  { %s1412_s29 = scalar_lea.hbm %s2015_s28, 256 }
  0x11   :  { %p1413_p0 = scmp.ne.s32.totalorder %s2015_s28, %s1412_s29  ;;  %p1416_p1 = scmp.lt.u32.totalorder %s1412_s29, %s2015_s28 }
  0x13   :  { %p1418_p2 = pnand %p1416_p1, %p1413_p0 }
  0x15   :  { %1421 = shalt.err (!%p1418_p2)
}
  0x16   :  { %s1422_s1 = scalar_lea.vmem %s44_s25, 256  ;;  %p1427_p4 = scmp.lt.s32.totalorder %s44_s25, %s44_s25 }
  0x17   :  { %p1423_p3 = scmp.ne.s32.totalorder %s44_s25, %s1422_s1  ;;  %p1428_p5 = scmp.lt.s32.totalorder %s1422_s1, %s1422_s1 }
  0x19   :  { %p1429_p6 = por %p1428_p5, %p1427_p4 }
  0x1b   :  { %p1430_p7 = pnand %p1429_p6, %p1423_p3 }
  0x1d   :  { %1433 = shalt.err (!%p1430_p7)
}
  0x1e   :  { %s1645_s20 = smov 64   ;;  %s1646_s21 = smov 4  }
  0x1f   :  { %49 = dma.hbm_to_vmem [thread:$0]  %s2015_s28, 256, %s44_s25, [#allocation6], %s1645_s20, %s1645_s20, %s1646_s21  }
  0x20   :  { %s1647_s24 = smov [#allocation8]   ;;  %s1648_s27 = smov [#allocation11]  }
  0x21   :  { %s67_s26 = sshll.u32 %s1647_s24, 4  ;;  %s91_s29 = sshll.u32 %s1648_s27, 4  ;;  %s68_s26 = int_to_ptr.vmem [resolvable:$true] %s67_s26  ;;  %s92_s29 = int_to_ptr.vmem [resolvable:$true] %s91_s29 }
  0x22   :  { %s1434_s18 = scalar_lea.hbm %s1993_s3, 1024 }
  0x23   :  { %p1435_p8 = scmp.ne.s32.totalorder %s1993_s3, %s1434_s18  ;;  %p1438_p9 = scmp.lt.u32.totalorder %s1434_s18, %s1993_s3 }
  0x25   :  { %p1440_p10 = pnand %p1438_p9, %p1435_p8 }
  0x27   :  { %1443 = shalt.err (!%p1440_p10)
}
  0x28   :  { %s1444_s25 = scalar_lea.vmem %s68_s26, 1024  ;;  %p1449_p12 = scmp.lt.s32.totalorder %s68_s26, %s68_s26 }
  0x29   :  { %p1445_p11 = scmp.ne.s32.totalorder %s68_s26, %s1444_s25  ;;  %p1450_p13 = scmp.lt.s32.totalorder %s1444_s25, %s1444_s25 }
  0x2b   :  { %p1451_p0 = por %p1450_p13, %p1449_p12 }
  0x2d   :  { %p1452_p1 = pnand %p1451_p0, %p1445_p11 }
  0x2f   :  { %1455 = shalt.err (!%p1452_p1)
}
  0x30   :  { %73 = dma.hbm_to_vmem [thread:$0]  %s1993_s3, 1024, %s68_s26, [#allocation9], %s1645_s20, %s1645_s20, %s1646_s21  }
  0x31   :  { %s1456_s17 = scalar_lea.hbm %s1995_s5, 1024 }
  0x32   :  { %p1457_p2 = scmp.ne.s32.totalorder %s1995_s5, %s1456_s17  ;;  %p1460_p3 = scmp.lt.u32.totalorder %s1456_s17, %s1995_s5 }
  0x34   :  { %p1462_p4 = pnand %p1460_p3, %p1457_p2 }
  0x36   :  { %1465 = shalt.err (!%p1462_p4)
}
  0x37   :  { %s1466_s18 = scalar_lea.vmem %s92_s29, 1024  ;;  %p1471_p6 = scmp.lt.s32.totalorder %s92_s29, %s92_s29 }
  0x38   :  { %p1467_p5 = scmp.ne.s32.totalorder %s92_s29, %s1466_s18  ;;  %p1472_p7 = scmp.lt.s32.totalorder %s1466_s18, %s1466_s18 }
  0x3a   :  { %p1473_p8 = por %p1472_p7, %p1471_p6 }
  0x3c   :  { %p1474_p9 = pnand %p1473_p8, %p1467_p5 }
  0x3e   :  { %1477 = shalt.err (!%p1474_p9)
}
  0x3f   :  { %97 = dma.hbm_to_vmem [thread:$0]  %s1995_s5, 1024, %s92_s29, [#allocation12], %s1645_s20, %s1645_s20, %s1646_s21  }
  0x40   :  { %s1649_s19 = smov [#allocation14]   ;;  %s1650_s25 = smov [#allocation2]  }
  0x41   :  { %s115_s1 = sshll.u32 %s1649_s19, 4  ;;  %s34_s28 = sshll.u32 %s1650_s25, 4  ;;  %s116_s1 = int_to_ptr.vmem [resolvable:$true] %s115_s1  ;;  %s35_s28 = int_to_ptr.vmem [resolvable:$true] %s34_s28 }
  0x42   :  { %s1478_s16 = scalar_lea.hbm %s1997_s7, 1024 }
  0x43   :  { %p1479_p10 = scmp.ne.s32.totalorder %s1997_s7, %s1478_s16  ;;  %p1482_p11 = scmp.lt.u32.totalorder %s1478_s16, %s1997_s7 }
  0x45   :  { %p1484_p12 = pnand %p1482_p11, %p1479_p10 }
  0x47   :  { %1487 = shalt.err (!%p1484_p12)
}
  0x48   :  { %s1488_s5 = scalar_lea.vmem %s116_s1, 1024  ;;  %p1493_p0 = scmp.lt.s32.totalorder %s116_s1, %s116_s1 }
  0x49   :  { %p1489_p13 = scmp.ne.s32.totalorder %s116_s1, %s1488_s5  ;;  %p1494_p1 = scmp.lt.s32.totalorder %s1488_s5, %s1488_s5 }
  0x4b   :  { %p1495_p2 = por %p1494_p1, %p1493_p0 }
  0x4d   :  { %p1496_p3 = pnand %p1495_p2, %p1489_p13 }
  0x4f   :  { %1499 = shalt.err (!%p1496_p3)
}
  0x50   :  { %121 = dma.hbm_to_vmem [thread:$0]  %s1997_s7, 1024, %s116_s1, [#allocation15], %s1645_s20, %s1645_s20, %s1646_s21  }
  0x51   :  { %s2016_s26 = sld [smem:[#allocation24_spill]] }
  0x57   :  { %s1500_s19 = scalar_lea.hbm %s2016_s26, 128 }
  0x58   :  { %p1501_p4 = scmp.ne.s32.totalorder %s2016_s26, %s1500_s19  ;;  %p1504_p5 = scmp.lt.u32.totalorder %s1500_s19, %s2016_s26 }
  0x5a   :  { %p1506_p6 = pnand %p1504_p5, %p1501_p4 }
  0x5c   :  { %1509 = shalt.err (!%p1506_p6)
}
  0x5d   :  { %s1510_s17 = scalar_lea.vmem %s35_s28, 128  ;;  %p1515_p8 = scmp.lt.s32.totalorder %s35_s28, %s35_s28 }
  0x5e   :  { %p1511_p7 = scmp.ne.s32.totalorder %s35_s28, %s1510_s17  ;;  %p1516_p9 = scmp.lt.s32.totalorder %s1510_s17, %s1510_s17 }
  0x60   :  { %p1517_p10 = por %p1516_p9, %p1515_p8 }
  0x62   :  { %p1518_p11 = pnand %p1517_p10, %p1511_p7 }
  0x64   :  { %1521 = shalt.err (!%p1518_p11)
}
  0x65   :  { %37 = dma.hbm_to_vmem [thread:$0]  %s2016_s26, 128, %s35_s28, [#allocation3]  }
  0x66   :  { %s1651_s24 = smov [#allocation7]   ;;  %s1652_s0 = smov [#allocation10]  }
  0x67   :  { %s55_s27 = sshll.u32 %s1651_s24, 4  ;;  %s79_s5 = sshll.u32 %s1652_s0, 4  ;;  %s56_s27 = int_to_ptr.vmem [resolvable:$true] %s55_s27  ;;  %s80_s5 = int_to_ptr.vmem [resolvable:$true] %s79_s5 }
  0x68   :  { %s1522_s18 = scalar_lea.hbm %s1992_s2, 1024 }
  0x69   :  { %p1523_p12 = scmp.ne.s32.totalorder %s1992_s2, %s1522_s18  ;;  %p1526_p13 = scmp.lt.u32.totalorder %s1522_s18, %s1992_s2 }
  0x6b   :  { %p1528_p0 = pnand %p1526_p13, %p1523_p12 }
  0x6d   :  { %1531 = shalt.err (!%p1528_p0)
}
  0x6e   :  { %s1532_s28 = scalar_lea.vmem %s56_s27, 1024  ;;  %p1537_p2 = scmp.lt.s32.totalorder %s56_s27, %s56_s27 }
  0x6f   :  { %p1533_p1 = scmp.ne.s32.totalorder %s56_s27, %s1532_s28  ;;  %p1538_p3 = scmp.lt.s32.totalorder %s1532_s28, %s1532_s28 }
  0x71   :  { %p1539_p4 = por %p1538_p3, %p1537_p2 }
  0x73   :  { %p1540_p5 = pnand %p1539_p4, %p1533_p1 }
  0x75   :  { %1543 = shalt.err (!%p1540_p5)
}
  0x76   :  { %61 = dma.hbm_to_vmem [thread:$0]  %s1992_s2, 1024, %s56_s27, [#allocation6], %s1645_s20, %s1645_s20, %s1646_s21  }
  0x77   :  { %s1544_s7 = scalar_lea.hbm %s1994_s4, 1024 }
  0x78   :  { %p1545_p6 = scmp.ne.s32.totalorder %s1994_s4, %s1544_s7  ;;  %p1548_p7 = scmp.lt.u32.totalorder %s1544_s7, %s1994_s4 }
  0x7a   :  { %p1550_p8 = pnand %p1548_p7, %p1545_p6 }
  0x7c   :  { %1553 = shalt.err (!%p1550_p8)
}
  0x7d   :  { %s1554_s30 = scalar_lea.vmem %s80_s5, 1024  ;;  %p1559_p10 = scmp.lt.s32.totalorder %s80_s5, %s80_s5 }
  0x7e   :  { %p1555_p9 = scmp.ne.s32.totalorder %s80_s5, %s1554_s30  ;;  %p1560_p11 = scmp.lt.s32.totalorder %s1554_s30, %s1554_s30 }
  0x80   :  { %p1561_p12 = por %p1560_p11, %p1559_p10 }
  0x82   :  { %p1562_p13 = pnand %p1561_p12, %p1555_p9 }
  0x84   :  { %1565 = shalt.err (!%p1562_p13)
}
  0x85   :  { %85 = dma.hbm_to_vmem [thread:$0]  %s1994_s4, 1024, %s80_s5, [#allocation9], %s1645_s20, %s1645_s20, %s1646_s21  }
  0x86   :  { %s1653_s18 = smov [#allocation13]   ;;  %s1654_s19 = smov [#allocation16]  }
  0x87   :  { %s103_s3 = sshll.u32 %s1653_s18, 4  ;;  %s127_s25 = sshll.u32 %s1654_s19, 4  ;;  %s104_s3 = int_to_ptr.vmem [resolvable:$true] %s103_s3  ;;  %s128_s25 = int_to_ptr.vmem [resolvable:$true] %s127_s25 }
  0x88   :  { %s1566_s26 = scalar_lea.hbm %s1996_s6, 1024 }
  0x89   :  { %p1567_p0 = scmp.ne.s32.totalorder %s1996_s6, %s1566_s26  ;;  %p1570_p1 = scmp.lt.u32.totalorder %s1566_s26, %s1996_s6 }
  0x8b   :  { %p1572_p2 = pnand %p1570_p1, %p1567_p0 }
  0x8d   :  { %1575 = shalt.err (!%p1572_p2)
}
  0x8e   :  { %s1576_s4 = scalar_lea.vmem %s104_s3, 1024  ;;  %p1581_p4 = scmp.lt.s32.totalorder %s104_s3, %s104_s3 }
  0x8f   :  { %p1577_p3 = scmp.ne.s32.totalorder %s104_s3, %s1576_s4  ;;  %p1582_p5 = scmp.lt.s32.totalorder %s1576_s4, %s1576_s4 }
  0x91   :  { %p1583_p6 = por %p1582_p5, %p1581_p4 }
  0x93   :  { %p1584_p7 = pnand %p1583_p6, %p1577_p3 }
  0x95   :  { %1587 = shalt.err (!%p1584_p7)
}
  0x96   :  { %109 = dma.hbm_to_vmem [thread:$0]  %s1996_s6, 1024, %s104_s3, [#allocation12], %s1645_s20, %s1645_s20, %s1646_s21  }
  0x97   :  { %s1588_s29 = scalar_lea.hbm %s1998_s8, 1024 }
  0x98   :  { %p1589_p8 = scmp.ne.s32.totalorder %s1998_s8, %s1588_s29  ;;  %p1592_p9 = scmp.lt.u32.totalorder %s1588_s29, %s1998_s8 }
  0x9a   :  { %p1594_p10 = pnand %p1592_p9, %p1589_p8 }
  0x9c   :  { %1597 = shalt.err (!%p1594_p10)
}
  0x9d   :  { %s1598_s19 = scalar_lea.vmem %s128_s25, 1024  ;;  %p1603_p12 = scmp.lt.s32.totalorder %s128_s25, %s128_s25 }
  0x9e   :  { %p1599_p11 = scmp.ne.s32.totalorder %s128_s25, %s1598_s19  ;;  %p1604_p13 = scmp.lt.s32.totalorder %s1598_s19, %s1598_s19 }
  0xa0   :  { %p1605_p0 = por %p1604_p13, %p1603_p12 }
  0xa2   :  { %p1606_p1 = pnand %p1605_p0, %p1599_p11 }
  0xa4   :  { %1609 = shalt.err (!%p1606_p1)
}
  0xa5   :  { %133 = dma.hbm_to_vmem [thread:$0]  %s1998_s8, 1024, %s128_s25, [#allocation15], %s1645_s20, %s1645_s20, %s1646_s21  }
  0xa6   :  { %1632 = dma.done.wait [#allocation3], 128  }
  0xa7   :  { %1633 = vsyncadd [#allocation3], 4294967168 }
  0xa8   :  { %1634 = dma.done.wait [#allocation6], 1280  }
  0xa9   :  { %1635 = vsyncadd [#allocation6], 4294966016 }
  0xaa   :  { %1636 = dma.done.wait [#allocation9], 2048  }
  0xab   :  { %1637 = vsyncadd [#allocation9], 4294965248 }
  0xac   :  { %1638 = dma.done.wait [#allocation12], 2048  }
  0xad   :  { %1639 = vsyncadd [#allocation12], 4294965248 }
  0xae   :  { %1640 = dma.done.wait [#allocation15], 2048  }
  0xaf   :  { %1641 = vsyncadd [#allocation15], 4294965248  ;;  %v1655_v0 = vmov 0.0   ;;  %vm1656_vm0 = vmmov 0   ;;  %v1354_v1 = vld [vmem:[#allocation5] sm:$0xff]   ;;  %v1355_v2 = vld [vmem:[#allocation5 + $0x8] sm:$0xff]  }
  0xb0   :  { %1192 = vmatprep.subr.bf16.mxu0 %v1655_v0  ;;  %1196 = vmatprep.mubr.msk.bf16.mxu0 %vm1656_vm0, %v1655_v0  ;;  %v178_v3 = vld [vmem:[#allocation2] sm:$0xff]  ;;  %v1356_v4 = vld [vmem:[#allocation7] sm:$0xff]   ;;  %vm203_vm1 = vcmask 261120   ;;  %v1358_v7 = vld [vmem:[#allocation7 + $0x10] sm:$0xff]   ;;  %s2017_s7 = sld [smem:[#allocation26_spill]]  ;;  %s1657_s4 = smov [#allocation17]  }
  0xb1   :  { %1200 = vmatprep.subr.bf16.mxu1 %v1655_v0  ;;  %1216 = vmatprep.mubr.msk.bf16.mxu1 %vm1656_vm0, %v1655_v0  ;;  %v179_v5 = vpack.c.bf16 %v178_v3, %v178_v3  ;;  %v1357_v6 = vld [vmem:[#allocation7 + $0x8] sm:$0xff]   ;;  %v1359_v8 = vld [vmem:[#allocation7 + $0x18] sm:$0xff]   ;;  %v1360_v9 = vld [vmem:[#allocation7 + $0x20] sm:$0xff]   ;;  %s1046_s5 = sshll.u32 %s1657_s4, 4  ;;  %s1047_s5 = int_to_ptr.vmem [resolvable:$true] %s1046_s5 }
  0xb2   :  { %1193 = vmatpush3.bf16.msra.mxu0 %v1354_v1  ;;  %1201 = vmatpush3.bf16.msra.mxu1 %v1356_v4  ;;  %v1361_v10 = vld [vmem:[#allocation7 + $0x28] sm:$0xff]   ;;  %v1362_v11 = vld [vmem:[#allocation7 + $0x30] sm:$0xff]   ;;  %v1363_v12 = vld [vmem:[#allocation7 + $0x38] sm:$0xff]   ;;  %p1615_p3 = scmp.lt.s32.totalorder %s1047_s5, %s1047_s5 }
  0xb3   :  { %1194 = vmatprep.subr.bf16.mxu0 %v1655_v0  ;;  %1202 = vmatprep.subr.bf16.mxu1 %v1655_v0  ;;  %v1364_v13 = vld [vmem:[#allocation8] sm:$0xff]   ;;  %v1365_v14 = vld [vmem:[#allocation8 + $0x8] sm:$0xff]   ;;  %v1366_v15 = vld [vmem:[#allocation8 + $0x10] sm:$0xff]  }
  0xb4   :  { %v1367_v16 = vld [vmem:[#allocation8 + $0x18] sm:$0xff]   ;;  %v1368_v17 = vld [vmem:[#allocation8 + $0x20] sm:$0xff]   ;;  %v1369_v18 = vld [vmem:[#allocation8 + $0x28] sm:$0xff]  }
  0xb5   :  { %v1059_v19 = vld [vmem:[%s1999_s9] ss:$0 sm:$0xff]  ;;  %v1370_v27 = vld [vmem:[#allocation8 + $0x30] sm:$0xff]   ;;  %v1371_v28 = vld [vmem:[#allocation8 + $0x38] sm:$0xff]  }
  0xb6   :  { %1195 = vmatpush3.bf16.msra.mxu0 %v1355_v2  ;;  %1203 = vmatpush3.bf16.msra.mxu1 %v1357_v6  ;;  %v1372_v29 = vld [vmem:[#allocation10] sm:$0xff]   ;;  %v1373_v30 = vld [vmem:[#allocation10 + $0x8] sm:$0xff]   ;;  %v1374_v31 = vld [vmem:[#allocation10 + $0x10] sm:$0xff]  }
  0xb7   :  { %1220 = vmatprep.subr.bf16.mxu0 %v1655_v0  ;;  %1204 = vmatprep.subr.bf16.mxu1 %v1655_v0  ;;  %v1375_v32 = vld [vmem:[#allocation10 + $0x18] sm:$0xff]   ;;  %v1376_v33 = vld [vmem:[#allocation10 + $0x20] sm:$0xff]   ;;  %v1377_v34 = vld [vmem:[#allocation10 + $0x28] sm:$0xff]  }
  0xb8   :  { %v1063_v35 = vld [vmem:[%s2000_s10] ss:$0 sm:$0xff]  ;;  %v1378_v43 = vld [vmem:[#allocation10 + $0x30] sm:$0xff]   ;;  %v1379_v44 = vld [vmem:[#allocation10 + $0x38] sm:$0xff]  }
  0xb9   :  { %1197 = vmatmul.mubr.msk.bf16.vlgmr.msra.gmra.mrb[0].mxu0 %vm203_vm1, %v179_v5  ;;  %v1380_v45 = vld [vmem:[#allocation11] sm:$0xff]   ;;  %v1381_v46 = vld [vmem:[#allocation11 + $0x8] sm:$0xff]   ;;  %v1382_v47 = vld [vmem:[#allocation11 + $0x10] sm:$0xff]  }
  0xba   :  { %1236 = vmatprep.mubr.msk.bf16.mxu0 %vm1656_vm0, %v1655_v0  ;;  %1205 = vmatpush3.bf16.msra.mxu1 %v1358_v7  ;;  %v1383_v48 = vld [vmem:[#allocation11 + $0x18] sm:$0xff]   ;;  %v1384_v49 = vld [vmem:[#allocation11 + $0x20] sm:$0xff]   ;;  %v1385_v50 = vld [vmem:[#allocation11 + $0x28] sm:$0xff]  }
  0xbb   :  { %1206 = vmatprep.subr.bf16.mxu1 %v1655_v0  ;;  %1221 = vmatpush3.bf16.msra.mxu0 %v1364_v13  ;;  %v1072_v51 = vld [vmem:[%s2001_s11] ss:$0 sm:$0xff]  ;;  %v1386_v59 = vld [vmem:[#allocation11 + $0x30] sm:$0xff]   ;;  %v1387_v60 = vld [vmem:[#allocation11 + $0x38] sm:$0xff]  }
  0xbc   :  { %1222 = vmatprep.subr.bf16.mxu0 %v1655_v0  ;;  %v1388_v61 = vld [vmem:[#allocation13] sm:$0xff]   ;;  %v1389_v62 = vld [vmem:[#allocation13 + $0x8] sm:$0xff]   ;;  %v1390_v63 = vld [vmem:[#allocation13 + $0x10] sm:$0xff]  }
  0xbd   :  { %v1391_v1 = vld [vmem:[#allocation13 + $0x18] sm:$0xff]   ;;  %v1392_v2 = vld [vmem:[#allocation13 + $0x20] sm:$0xff]   ;;  %v1393_v3 = vld [vmem:[#allocation13 + $0x28] sm:$0xff]  }
  0xbe   :  { %1207 = vmatpush3.bf16.msra.mxu1 %v1359_v8  ;;  %v1081_v4 = vld [vmem:[%s2002_s12] ss:$0 sm:$0xff]  ;;  %v1395_v13 = vld [vmem:[#allocation13 + $0x38] sm:$0xff]  }
  0xbf   :  { %1208 = vmatprep.subr.bf16.mxu1 %v1655_v0  ;;  %1223 = vmatpush3.bf16.msra.mxu0 %v1365_v14  ;;  %v1396_v14 = vld [vmem:[#allocation14] sm:$0xff]  }
  0xc0   :  { %1224 = vmatprep.subr.bf16.mxu0 %v1655_v0 }
  0xc2   :  { %1209 = vmatpush3.bf16.msra.mxu1 %v1360_v9 }
  0xc3   :  { %1210 = vmatprep.subr.bf16.mxu1 %v1655_v0  ;;  %1225 = vmatpush3.bf16.msra.mxu0 %v1366_v15  ;;  %v1397_v15 = vld [vmem:[#allocation14 + $0x8] sm:$0xff]  }
  0xc4   :  { %1226 = vmatprep.subr.bf16.mxu0 %v1655_v0 }
  0xc6   :  { %1211 = vmatpush3.bf16.msra.mxu1 %v1361_v10 }
  0xc7   :  { %1212 = vmatprep.subr.bf16.mxu1 %v1655_v0  ;;  %1227 = vmatpush3.bf16.msra.mxu0 %v1367_v16  ;;  %v1398_v16 = vld [vmem:[#allocation14 + $0x10] sm:$0xff]  }
  0xc8   :  { %1228 = vmatprep.subr.bf16.mxu0 %v1655_v0 }
  0xca   :  { %1213 = vmatpush3.bf16.msra.mxu1 %v1362_v11 }
  0xcb   :  { %1214 = vmatprep.subr.bf16.mxu1 %v1655_v0  ;;  %1229 = vmatpush3.bf16.msra.mxu0 %v1368_v17  ;;  %v1399_v17 = vld [vmem:[#allocation14 + $0x18] sm:$0xff]  }
  0xcc   :  { %1230 = vmatprep.subr.bf16.mxu0 %v1655_v0 }
  0xce   :  { %1215 = vmatpush3.bf16.msra.mxu1 %v1363_v12  ;;  %v1394_v12 = vld [vmem:[#allocation13 + $0x30] sm:$0xff]  }
  0xcf   :  { %1240 = vmatprep.subr.bf16.mxu1 %v1655_v0  ;;  %1231 = vmatpush3.bf16.msra.mxu0 %v1369_v18  ;;  %v1400_v18 = vld [vmem:[#allocation14 + $0x20] sm:$0xff]  }
  0xd0   :  { %1232 = vmatprep.subr.bf16.mxu0 %v1655_v0 }
  0xd3   :  { %1233 = vmatpush3.bf16.msra.mxu0 %v1370_v27 }
  0xd4   :  { %1234 = vmatprep.subr.bf16.mxu0 %v1655_v0 }
  0xd7   :  { %1235 = vmatpush3.bf16.msra.mxu0 %v1371_v28  ;;  %v1402_v28 = vld [vmem:[#allocation14 + $0x30] sm:$0xff]  }
  0xd8   :  { %1260 = vmatprep.subr.bf16.mxu0 %v1655_v0 }
 0x18c   :  { %v241_v20 = vpop.f32.mrb[0].mxu0 }
 0x18d   :  { %v242_v21 = vadd.f32 %v1059_v19, %v241_v20  ;;  %v1198_v22 = vpop.f32.mrb[1].mxu0  ;;  %v1401_v19 = vld [vmem:[#allocation14 + $0x28] sm:$0xff]  }
 0x18e   :  { %v244_v23 = vpop.f32.mrb[2].mxu0  ;;  %v1090_v20 = vld [vmem:[%s2003_s13] ss:$0 sm:$0xff] }
 0x18f   :  { %v247_v24 = vmax.f32 %v242_v21, 0.0  ;;  %v1199_v25 = vpop.f32.mrb[3].mxu0 }
 0x191   :  { %v248_v26 = vpack.c.bf16 %v247_v24, %v247_v24 }
 0x193   :  { %1217 = vmatmul.mubr.bf16.vlgmr.msra.gmra.mrb[0].mxu1 %v248_v26 }
 0x194   :  { %1256 = vmatprep.mubr.msk.bf16.mxu1 %vm1656_vm0, %v1655_v0  ;;  %1241 = vmatpush3.bf16.msra.mxu1 %v1372_v29  ;;  %v1403_v29 = vld [vmem:[#allocation14 + $0x38] sm:$0xff]  }
 0x195   :  { %1242 = vmatprep.subr.bf16.mxu1 %v1655_v0 }
 0x198   :  { %1243 = vmatpush3.bf16.msra.mxu1 %v1373_v30  ;;  %v1404_v30 = vld [vmem:[#allocation16] sm:$0xff]  }
 0x199   :  { %1244 = vmatprep.subr.bf16.mxu1 %v1655_v0 }
 0x19c   :  { %1245 = vmatpush3.bf16.msra.mxu1 %v1374_v31  ;;  %v1405_v31 = vld [vmem:[#allocation16 + $0x8] sm:$0xff]  }
 0x19d   :  { %1246 = vmatprep.subr.bf16.mxu1 %v1655_v0 }
 0x1a0   :  { %1247 = vmatpush3.bf16.msra.mxu1 %v1375_v32  ;;  %v1406_v32 = vld [vmem:[#allocation16 + $0x10] sm:$0xff]  }
 0x1a1   :  { %1248 = vmatprep.subr.bf16.mxu1 %v1655_v0 }
 0x1a4   :  { %1249 = vmatpush3.bf16.msra.mxu1 %v1376_v33  ;;  %v1407_v33 = vld [vmem:[#allocation16 + $0x18] sm:$0xff]  }
 0x1a5   :  { %1250 = vmatprep.subr.bf16.mxu1 %v1655_v0 }
 0x1a8   :  { %1251 = vmatpush3.bf16.msra.mxu1 %v1377_v34  ;;  %v1408_v34 = vld [vmem:[#allocation16 + $0x20] sm:$0xff]  }
 0x1a9   :  { %1252 = vmatprep.subr.bf16.mxu1 %v1655_v0 }
 0x1ac   :  { %1253 = vmatpush3.bf16.msra.mxu1 %v1378_v43 }
 0x1ad   :  { %1254 = vmatprep.subr.bf16.mxu1 %v1655_v0 }
 0x1b0   :  { %1255 = vmatpush3.bf16.msra.mxu1 %v1379_v44  ;;  %v1410_v44 = vld [vmem:[#allocation16 + $0x30] sm:$0xff]  }
 0x1b1   :  { %1280 = vmatprep.subr.bf16.mxu1 %v1655_v0 }
 0x266   :  { %v354_v36 = vpop.f32.mrb[0].mxu1 }
 0x267   :  { %v355_v37 = vadd.f32 %v1063_v35, %v354_v36  ;;  %v1218_v38 = vpop.f32.mrb[1].mxu1  ;;  %v1409_v35 = vld [vmem:[#allocation16 + $0x28] sm:$0xff]  }
 0x268   :  { %v357_v39 = vpop.f32.mrb[2].mxu1  ;;  %v1099_v36 = vld [vmem:[%s2004_s14] ss:$0 sm:$0xff] }
 0x269   :  { %v360_v40 = vmax.f32 %v355_v37, 0.0  ;;  %v1219_v41 = vpop.f32.mrb[3].mxu1 }
 0x26b   :  { %v361_v42 = vpack.c.bf16 %v360_v40, %v360_v40 }
 0x26d   :  { %1237 = vmatmul.mubr.bf16.vlgmr.msra.gmra.mrb[4].mxu0 %v361_v42 }
 0x26e   :  { %1276 = vmatprep.mubr.msk.bf16.mxu0 %vm1656_vm0, %v1655_v0  ;;  %1261 = vmatpush3.bf16.msra.mxu0 %v1380_v45  ;;  %v1411_v45 = vld [vmem:[#allocation16 + $0x38] sm:$0xff]  }
 0x26f   :  { %1262 = vmatprep.subr.bf16.mxu0 %v1655_v0 }
 0x272   :  { %1263 = vmatpush3.bf16.msra.mxu0 %v1381_v46  ;;  %v1108_v46 = vld [vmem:[%s2005_s15] ss:$0 sm:$0xff]  ;;  %s1610_s15 = scalar_lea.vmem %s1047_s5, 128 }
 0x273   :  { %1264 = vmatprep.subr.bf16.mxu0 %v1655_v0  ;;  %p1611_p2 = scmp.ne.s32.totalorder %s1047_s5, %s1610_s15  ;;  %p1616_p4 = scmp.lt.s32.totalorder %s1610_s15, %s1610_s15 }
 0x275   :  { %p1617_p5 = por %p1616_p4, %p1615_p3 }
 0x276   :  { %1265 = vmatpush3.bf16.msra.mxu0 %v1382_v47 }
 0x277   :  { %1266 = vmatprep.subr.bf16.mxu0 %v1655_v0  ;;  %p1618_p6 = pnand %p1617_p5, %p1611_p2 }
 0x27a   :  { %1267 = vmatpush3.bf16.msra.mxu0 %v1383_v48 }
 0x27b   :  { %1268 = vmatprep.subr.bf16.mxu0 %v1655_v0 }
 0x27e   :  { %1269 = vmatpush3.bf16.msra.mxu0 %v1384_v49 }
 0x27f   :  { %1270 = vmatprep.subr.bf16.mxu0 %v1655_v0 }
 0x282   :  { %1271 = vmatpush3.bf16.msra.mxu0 %v1385_v50 }
 0x283   :  { %1272 = vmatprep.subr.bf16.mxu0 %v1655_v0 }
 0x286   :  { %1273 = vmatpush3.bf16.msra.mxu0 %v1386_v59 }
 0x287   :  { %1274 = vmatprep.subr.bf16.mxu0 %v1655_v0 }
 0x28a   :  { %1275 = vmatpush3.bf16.msra.mxu0 %v1387_v60 }
 0x28b   :  { %1300 = vmatprep.subr.bf16.mxu0 %v1655_v0 }
 0x340   :  { %v467_v52 = vpop.f32.mrb[4].mxu0 }
 0x341   :  { %v468_v53 = vadd.f32 %v1072_v51, %v467_v52  ;;  %v1238_v54 = vpop.f32.mrb[5].mxu0 }
 0x342   :  { %v470_v55 = vpop.f32.mrb[6].mxu0  ;;  %v1117_v54 = vld [vmem:[%s2017_s7] ss:$0 sm:$0xff] }
 0x343   :  { %v473_v56 = vmax.f32 %v468_v53, 0.0  ;;  %v1239_v57 = vpop.f32.mrb[7].mxu0 }
 0x345   :  { %v474_v58 = vpack.c.bf16 %v473_v56, %v473_v56 }
 0x347   :  { %1257 = vmatmul.mubr.bf16.vlgmr.msra.gmra.mrb[4].mxu1 %v474_v58 }
 0x348   :  { %1296 = vmatprep.mubr.msk.bf16.mxu1 %vm1656_vm0, %v1655_v0  ;;  %1281 = vmatpush3.bf16.msra.mxu1 %v1388_v61 }
 0x349   :  { %1282 = vmatprep.subr.bf16.mxu1 %v1655_v0 }
 0x34c   :  { %1283 = vmatpush3.bf16.msra.mxu1 %v1389_v62 }
 0x34d   :  { %1284 = vmatprep.subr.bf16.mxu1 %v1655_v0 }
 0x350   :  { %1285 = vmatpush3.bf16.msra.mxu1 %v1390_v63 }
 0x351   :  { %1286 = vmatprep.subr.bf16.mxu1 %v1655_v0 }
 0x354   :  { %1287 = vmatpush3.bf16.msra.mxu1 %v1391_v1 }
 0x355   :  { %1288 = vmatprep.subr.bf16.mxu1 %v1655_v0 }
 0x358   :  { %1289 = vmatpush3.bf16.msra.mxu1 %v1392_v2 }
 0x359   :  { %1290 = vmatprep.subr.bf16.mxu1 %v1655_v0 }
 0x35c   :  { %1291 = vmatpush3.bf16.msra.mxu1 %v1393_v3 }
 0x35d   :  { %1292 = vmatprep.subr.bf16.mxu1 %v1655_v0 }
 0x360   :  { %1293 = vmatpush3.bf16.msra.mxu1 %v1394_v12 }
 0x361   :  { %1294 = vmatprep.subr.bf16.mxu1 %v1655_v0 }
 0x364   :  { %1295 = vmatpush3.bf16.msra.mxu1 %v1395_v13 }
 0x365   :  { %1320 = vmatprep.subr.bf16.mxu1 %v1655_v0 }
 0x41a   :  { %v580_v5 = vpop.f32.mrb[4].mxu1 }
 0x41b   :  { %v581_v6 = vadd.f32 %v1081_v4, %v580_v5  ;;  %v1258_v7 = vpop.f32.mrb[5].mxu1 }
 0x41c   :  { %v583_v8 = vpop.f32.mrb[6].mxu1 }
 0x41d   :  { %v586_v9 = vmax.f32 %v581_v6, 0.0  ;;  %v1259_v10 = vpop.f32.mrb[7].mxu1 }
 0x41f   :  { %v587_v11 = vpack.c.bf16 %v586_v9, %v586_v9 }
 0x421   :  { %1277 = vmatmul.mubr.bf16.vlgmr.msra.gmra.mrb[8].mxu0 %v587_v11 }
 0x422   :  { %1316 = vmatprep.mubr.msk.bf16.mxu0 %vm1656_vm0, %v1655_v0  ;;  %1301 = vmatpush3.bf16.msra.mxu0 %v1396_v14 }
 0x423   :  { %1302 = vmatprep.subr.bf16.mxu0 %v1655_v0 }
 0x426   :  { %1303 = vmatpush3.bf16.msra.mxu0 %v1397_v15 }
 0x427   :  { %1304 = vmatprep.subr.bf16.mxu0 %v1655_v0 }
 0x42a   :  { %1305 = vmatpush3.bf16.msra.mxu0 %v1398_v16 }
 0x42b   :  { %1306 = vmatprep.subr.bf16.mxu0 %v1655_v0 }
 0x42e   :  { %1307 = vmatpush3.bf16.msra.mxu0 %v1399_v17 }
 0x42f   :  { %1308 = vmatprep.subr.bf16.mxu0 %v1655_v0 }
 0x432   :  { %1309 = vmatpush3.bf16.msra.mxu0 %v1400_v18 }
 0x433   :  { %1310 = vmatprep.subr.bf16.mxu0 %v1655_v0 }
 0x436   :  { %1311 = vmatpush3.bf16.msra.mxu0 %v1401_v19 }
 0x437   :  { %1312 = vmatprep.subr.bf16.mxu0 %v1655_v0 }
 0x43a   :  { %1313 = vmatpush3.bf16.msra.mxu0 %v1402_v28 }
 0x43b   :  { %1314 = vmatprep.subr.bf16.mxu0 %v1655_v0 }
 0x43e   :  { %1315 = vmatpush3.bf16.msra.mxu0 %v1403_v29 }
 0x4f4   :  { %v693_v21 = vpop.f32.mrb[8].mxu0 }
 0x4f5   :  { %v694_v22 = vadd.f32 %v1090_v20, %v693_v21  ;;  %v1278_v23 = vpop.f32.mrb[9].mxu0 }
 0x4f6   :  { %v696_v24 = vpop.f32.mrb[10].mxu0 }
 0x4f7   :  { %v699_v25 = vmax.f32 %v694_v22, 0.0  ;;  %v1279_v26 = vpop.f32.mrb[11].mxu0 }
 0x4f9   :  { %v700_v27 = vpack.c.bf16 %v699_v25, %v699_v25 }
 0x4fb   :  { %1297 = vmatmul.mubr.bf16.vlgmr.msra.gmra.mrb[8].mxu1 %v700_v27 }
 0x4fc   :  { %1336 = vmatprep.mubr.msk.bf16.mxu1 %vm1656_vm0, %v1655_v0  ;;  %1321 = vmatpush3.bf16.msra.mxu1 %v1404_v30 }
 0x4fd   :  { %1322 = vmatprep.subr.bf16.mxu1 %v1655_v0 }
 0x500   :  { %1323 = vmatpush3.bf16.msra.mxu1 %v1405_v31 }
 0x501   :  { %1324 = vmatprep.subr.bf16.mxu1 %v1655_v0 }
 0x504   :  { %1325 = vmatpush3.bf16.msra.mxu1 %v1406_v32 }
 0x505   :  { %1326 = vmatprep.subr.bf16.mxu1 %v1655_v0 }
 0x508   :  { %1327 = vmatpush3.bf16.msra.mxu1 %v1407_v33 }
 0x509   :  { %1328 = vmatprep.subr.bf16.mxu1 %v1655_v0 }
 0x50c   :  { %1329 = vmatpush3.bf16.msra.mxu1 %v1408_v34 }
 0x50d   :  { %1330 = vmatprep.subr.bf16.mxu1 %v1655_v0 }
 0x510   :  { %1331 = vmatpush3.bf16.msra.mxu1 %v1409_v35 }
 0x511   :  { %1332 = vmatprep.subr.bf16.mxu1 %v1655_v0 }
 0x514   :  { %1333 = vmatpush3.bf16.msra.mxu1 %v1410_v44 }
 0x515   :  { %1334 = vmatprep.subr.bf16.mxu1 %v1655_v0 }
 0x518   :  { %1335 = vmatpush3.bf16.msra.mxu1 %v1411_v45 }
 0x5ce   :  { %v806_v37 = vpop.f32.mrb[8].mxu1 }
 0x5cf   :  { %v807_v38 = vadd.f32 %v1099_v36, %v806_v37  ;;  %v1298_v39 = vpop.f32.mrb[9].mxu1 }
 0x5d0   :  { %v809_v40 = vpop.f32.mrb[10].mxu1 }
 0x5d1   :  { %v812_v41 = vmax.f32 %v807_v38, 0.0  ;;  %v1299_v42 = vpop.f32.mrb[11].mxu1 }
 0x5d3   :  { %v813_v43 = vpack.c.bf16 %v812_v41, %v812_v41 }
 0x5d5   :  { %1317 = vmatmul.mubr.bf16.vlgmr.msra.gmra.mrb[12].mxu0 %v813_v43 }
 0x6a8   :  { %v919_v47 = vpop.f32.mrb[12].mxu0 }
 0x6a9   :  { %v920_v48 = vadd.f32 %v1108_v46, %v919_v47  ;;  %v1318_v49 = vpop.f32.mrb[13].mxu0 }
 0x6aa   :  { %v922_v50 = vpop.f32.mrb[14].mxu0 }
 0x6ab   :  { %v925_v51 = vmax.f32 %v920_v48, 0.0  ;;  %v1319_v52 = vpop.f32.mrb[15].mxu0 }
 0x6ad   :  { %v926_v53 = vpack.c.bf16 %v925_v51, %v925_v51 }
 0x6af   :  { %1337 = vmatmul.mubr.bf16.vlgmr.msra.gmra.mrb[12].mxu1 %v926_v53 }
 0x782   :  { %v1032_v55 = vpop.f32.mrb[12].mxu1 }
 0x783   :  { %v1033_v0 = vadd.f32 %v1117_v54, %v1032_v55  ;;  %v1338_v56 = vpop.f32.mrb[13].mxu1 }
 0x784   :  { %v1035_v57 = vpop.f32.mrb[14].mxu1 }
 0x785   :  { %v1038_v58 = vmax.f32 %v1033_v0, 0.0  ;;  %v1339_v59 = vpop.f32.mrb[15].mxu1 }
 0x787   :  { %1039 = vst [vmem:[#allocation17] sm:$0xff] %v1038_v58 }
 0x788   :  { %1621 = shalt.err (!%p1618_p6)
}
 0x789   :  { %s2018_s0 = sld [smem:[#allocation27_spill]] }
 0x78f   :  { %s1622_s29 = scalar_lea.hbm %s2018_s0, 128 }
 0x790   :  { %p1623_p7 = scmp.ne.s32.totalorder %s2018_s0, %s1622_s29  ;;  %p1626_p8 = scmp.lt.u32.totalorder %s1622_s29, %s2018_s0 }
 0x792   :  { %p1628_p9 = pnand %p1626_p8, %p1623_p7 }
 0x794   :  { %1631 = shalt.err (!%p1628_p9)
}
 0x795   :  { %1049 = dma.vmem_to_hbm [thread:$0]  %s1047_s5, 128, %s2018_s0, [#allocation4]  }
 0x796   :  { %1642 = dma.done.wait [#allocation4], 128  }
 0x797   :  { %1643 = vsyncadd [#allocation4], 4294967168 }
 0x798   :  { %1053 = vsyncpa [#allocation3], 1 }
 0x799   :  { %1054 = vsyncpa [#allocation6], 1 }
 0x79a   :  { %1055 = vsyncpa [#allocation9], 1 }
 0x79b   :  { %1056 = vsyncpa [#allocation12], 1 }
 0x79c   :  { %1057 = vsyncpa [#allocation15], 1 }
 0x79d   :  { %1058 = vsyncpa [#allocation4], 1 }

</bundles_post_ra>
